<compile_context>
chip_gen: v5e
topology: v5e:2x2
jax: 0.10.0
libtpu: 0.0.40
codegen_flags: <defaults>
</compile_context>

<pallas_src>
import jax
import jax.numpy as jnp
from jax.experimental import pallas as pl
from jax.experimental.pallas import tpu as pltpu


def _round_up(x, m):
    return (x + m - 1) // m * m


def _vmem_cap_bytes():
    """Generation-aware scoped-VMEM cap (~75% of physical VMEM)."""
    try:
        cap = int(pltpu.get_tpu_info().vmem_capacity_bytes)
        return max(cap * 3 // 4, 32 << 20)
    except Exception:
        return 48 << 20   # safe for every generation (v7x has 64 MiB physical)


def lp_net_kernel(x_ref, w_enc_ref, b_enc_ref, w_cls_ref, b_cls_ref,
                  out_ref, acc_ref):
    """One (m, k) grid step. k (= flattened-image dim) is the reduction axis."""
    k = pl.program_id(1)

    @pl.when(k == 0)
    def _init():
        acc_ref[...] = jnp.zeros_like(acc_ref)

    # Synthetic "encode_image" partial product: z += x_tile @ w_enc_tile.
    # x streams as f32 (half the wrapper-side HBM traffic of a pre-cast copy);
    # the bf16 cast happens here on the VPU, accumulation is f32 on the MXU.
    acc_ref[...] += jnp.dot(x_ref[...].astype(jnp.bfloat16), w_enc_ref[...],
                            preferred_element_type=jnp.float32)

    @pl.when(k == pl.num_programs(1) - 1)
    def _epilogue():
        # Encoder bias added exactly once (f32); classifier kept fully in f32
        # (epilogue-only and tiny -> free; matches PyTorch f32 semantics).
        z = acc_ref[...] + b_enc_ref[...]
        pred = jnp.dot(z, w_cls_ref[...],
                       preferred_element_type=jnp.float32) + b_cls_ref[...]
        out_ref[...] = pred.astype(out_ref.dtype)


def prepare_lp_net_params(w_enc, b_enc, w_cls, b_cls, *, tk=1024):
    """Cast/pad the FROZEN parameters once at init (not per forward call).

    w_enc: [d_img, dim_in]   (stand-in for the frozen CLIP image encoder)
    b_enc: [1, dim_in] (or [dim_in])
    w_cls: [dim_in, num_classes]  (x @ W + b layout == PyTorch x @ W.T + b)
    b_cls: [1, num_classes] (or [num_classes])
    """
    d_img, dim_in = w_enc.shape
    num_classes = w_cls.shape[1]
    d_img_p = _round_up(d_img, tk)
    dim_in_p = _round_up(dim_in, 128)
    nc_p = _round_up(num_classes, 128)

    # Streamed encoder weight in bf16 (dominant HBM traffic); classifier and
    # biases stay f32 (tiny, VMEM-resident).
    w_enc_p = jnp.pad(w_enc.astype(jnp.bfloat16),
                      ((0, d_img_p - d_img), (0, dim_in_p - dim_in)))
    b_enc_p = jnp.pad(jnp.asarray(b_enc, jnp.float32).reshape(1, dim_in),
                      ((0, 0), (0, dim_in_p - dim_in)))
    w_cls_p = jnp.pad(w_cls.astype(jnp.float32),
                      ((0, dim_in_p - dim_in), (0, nc_p - num_classes)))
    b_cls_p = jnp.pad(jnp.asarray(b_cls, jnp.float32).reshape(1, num_classes),
                      ((0, 0), (0, nc_p - num_classes)))

    params = (w_enc_p, b_enc_p, w_cls_p, b_cls_p)
    meta = dict(d_img=d_img, dim_in=dim_in, num_classes=num_classes, tk=tk)
    return params, meta


def lp_net_forward(x_nchw, params, meta, *, tm=512):
    """LP_Net forward: z = encode_image(x); pred = classifier(z).

    x_nchw: [B, C, H, W] f32.  `params` / `meta` come from
    prepare_lp_net_params (frozen-weight preprocessing hoisted out of the
    per-call path).  Returns logits [B, num_classes] f32.

    Tile notes: tm defaults to 512 (capped by batch and the generation's VMEM
    budget) so num_m is 1-2 and w_enc HBM traffic ~= |w_enc|; tk comes from
    param prep (default 1024).  w_enc gets Buffered(3) when the K loop is deep.
    """
    w_enc_p, b_enc_p, w_cls_p, b_cls_p = params
    d_img = meta["d_img"]
    num_classes = meta["num_classes"]
    tk = meta["tk"]
    d_img_p, dim_in_p = w_enc_p.shape
    nc_p = w_cls_p.shape[1]

    B = x_nchw.shape[0]
    d_img_x = 1
    for s in x_nchw.shape[1:]:
        d_img_x *= s
    assert d_img_x == d_img, "image shape inconsistent with prepared w_enc"

    # Batch tile: big enough that w_enc is re-streamed at most 1-2x, capped by
    # batch size and by the generation-specific VMEM budget.
    vmem_cap = _vmem_cap_bytes()
    tm = _round_up(max(128, min(tm, _round_up(B, 128))), 128)

    num_k = d_img_p // tk
    buf_w = 3 if num_k >= 3 else 2   # deeper buffering on the critical stream

    def _vmem_need(tm_):
        return (2 * tm_ * tk * 4              # x tile (f32), 2-deep
                + buf_w * tk * dim_in_p * 2   # w_enc tile (bf16), buf_w-deep
                + 2 * dim_in_p * 4            # b_enc (f32, resident)
                + 2 * dim_in_p * nc_p * 4     # w_cls (f32, resident)
                + 2 * nc_p * 4                # b_cls (f32, resident)
                + 2 * tm_ * nc_p * 4          # output tile (f32), 2-deep
                + tm_ * dim_in_p * 4)         # f32 accumulator scratch

    while _vmem_need(tm) > vmem_cap and tm > 128:
        tm -= 128

    B_p = _round_up(B, tm)
    num_m = B_p // tm

    # Per-call plumbing on the *activation* only: flatten + pad, keep f32.
    x_flat = x_nchw.reshape(B, d_img)
    x_p = jnp.pad(x_flat, ((0, B_p - B), (0, d_img_p - d_img)))

    vmem_limit = int(min(max(3 * _vmem_need(tm) // 2, 16 << 20), vmem_cap))

    cost = pl.CostEstimate(
        flops=2 * B_p * d_img_p * dim_in_p + 2 * B_p * dim_in_p * nc_p,
        transcendentals=0,
        bytes_accessed=(x_p.size * 4 + w_enc_p.size * 2 * num_m
                        + w_cls_p.size * 4 + b_enc_p.size * 4
                        + b_cls_p.size * 4 + B_p * nc_p * 4),
    )

    if buf_w == 3:
        w_enc_spec = pl.BlockSpec((tk, dim_in_p), lambda i, k: (k, 0),
                                  pipeline_mode=pl.Buffered(3))
    else:
        w_enc_spec = pl.BlockSpec((tk, dim_in_p), lambda i, k: (k, 0))

    out_p = pl.pallas_call(
        lp_net_kernel,
        out_shape=jax.ShapeDtypeStruct((B_p, nc_p), jnp.float32),
        grid_spec=pltpu.PrefetchScalarGridSpec(
            num_scalar_prefetch=0,
            grid=(num_m, num_k),
            in_specs=[
                pl.BlockSpec((tm, tk), lambda i, k: (i, k)),          # x (f32)
                w_enc_spec,                                           # w_enc (bf16)
                pl.BlockSpec((1, dim_in_p), lambda i, k: (0, 0)),     # b_enc (f32)
                pl.BlockSpec((dim_in_p, nc_p), lambda i, k: (0, 0)),  # w_cls (f32)
                pl.BlockSpec((1, nc_p), lambda i, k: (0, 0)),         # b_cls (f32)
            ],
            out_specs=pl.BlockSpec((tm, nc_p), lambda i, k: (i, 0)),
            scratch_shapes=[pltpu.VMEM((tm, dim_in_p), jnp.float32)],
        ),
        compiler_params=pltpu.CompilerParams(
            dimension_semantics=("parallel", "arbitrary"),
            vmem_limit_bytes=vmem_limit,
        ),
        cost_estimate=cost,
    )(x_p, w_enc_p, b_enc_p, w_cls_p, b_cls_p)

    return out_p[:B, :num_classes]


if __name__ == "__main__":
    # --- Test 1: small shapes consistent with the module's forward ---------
    B, C, H, W = 2, 4, 16, 16        # image batch (NCHW)
    dim_in = 32                      # CLIP feature dim (classifier in_features)
    num_classes = 8

    key = jax.random.PRNGKey(0)
    k_x, k_we, k_be, k_wc, k_bc = jax.random.split(key, 5)

    x = jax.random.normal(k_x, (B, C, H, W), dtype=jnp.float32)
    d_img = C * H * W
    # Deterministic synthetic encoder params (stand-in for frozen CLIP).
    w_enc = jax.random.normal(k_we, (d_img, dim_in), dtype=jnp.float32) * 0.02
    b_enc = jax.random.normal(k_be, (1, dim_in), dtype=jnp.float32) * 0.02
    # Classifier params (nn.Linear(dim_in, num_classes)), f32 as in LP_Net.
    w_cls = jax.random.normal(k_wc, (dim_in, num_classes), dtype=jnp.float32) * 0.1
    b_cls = jax.random.normal(k_bc, (1, num_classes), dtype=jnp.float32) * 0.1

    # Frozen-weight preprocessing done ONCE (hoisted out of the forward path).
    params, meta = prepare_lp_net_params(w_enc, b_enc, w_cls, b_cls, tk=1024)

    pred = jax.block_until_ready(lp_net_forward(x, params, meta))
    assert pred.shape == (B, num_classes)

    # Reference 1: same bf16-operand / f32-accumulate encoder + f32 classifier
    # path as the kernel (tight check of tiling, padding, bias gating).
    x_bf = x.reshape(B, d_img).astype(jnp.bfloat16)
    z_ref = jnp.dot(x_bf, w_enc.astype(jnp.bfloat16),
                    preferred_element_type=jnp.float32) + b_enc
    pred_ref = z_ref @ w_cls + b_cls
    assert jnp.allclose(pred, pred_ref, atol=2e-3, rtol=2e-3)

    # Reference 2: pure-f32 module semantics (loose: bf16 streaming error only).
    z_f32 = x.reshape(B, d_img) @ w_enc + b_enc
    pred_f32 = z_f32 @ w_cls + b_cls
    assert jnp.allclose(pred, pred_f32, atol=1e-1, rtol=1e-1)

    # --- Test 2: multi-tile config (exercises num_m=2, num_k=6, Buffered(3),
    # accumulator init/epilogue gating on the reduction axis) ----------------
    B2, C2, H2, W2 = 160, 3, 32, 32
    dim_in2, nc2 = 64, 10
    kk = jax.random.split(jax.random.PRNGKey(1), 5)
    x2 = jax.random.normal(kk[0], (B2, C2, H2, W2), dtype=jnp.float32)
    d2 = C2 * H2 * W2
    w_enc2 = jax.random.normal(kk[1], (d2, dim_in2), dtype=jnp.float32) * 0.02
    b_enc2 = jax.random.normal(kk[2], (1, dim_in2), dtype=jnp.float32) * 0.02
    w_cls2 = jax.random.normal(kk[3], (dim_in2, nc2), dtype=jnp.float32) * 0.1
    b_cls2 = jax.random.normal(kk[4], (1, nc2), dtype=jnp.float32) * 0.1

    params2, meta2 = prepare_lp_net_params(w_enc2, b_enc2, w_cls2, b_cls2, tk=512)
    pred2 = jax.block_until_ready(lp_net_forward(x2, params2, meta2, tm=128))
    assert pred2.shape == (B2, nc2)

    z2 = jnp.dot(x2.reshape(B2, d2).astype(jnp.bfloat16),
                 w_enc2.astype(jnp.bfloat16),
                 preferred_element_type=jnp.float32) + b_enc2
    ref2 = z2 @ w_cls2 + b_cls2
    assert jnp.allclose(pred2, ref2, atol=2e-3, rtol=2e-3)

    print("KERNEL_OK")
</pallas_src>

<mosaic_0001>
module attributes {stable_mosaic.version = 11 : i64} {
  func.func @lp_net_kernel(%arg0: i32, %arg1: i32, %arg2: memref<128x1024xf32, #tpu.memory_space<vmem>>, %arg3: memref<1024x128xbf16, #tpu.memory_space<vmem>>, %arg4: memref<1x128xf32, #tpu.memory_space<vmem>>, %arg5: memref<128x128xf32, #tpu.memory_space<vmem>>, %arg6: memref<1x128xf32, #tpu.memory_space<vmem>>, %arg7: memref<128x128xf32, #tpu.memory_space<vmem>>, %arg8: memref<128x128xf32, #tpu.memory_space<vmem>>) attributes {dimension_semantics = [#tpu.dimension_semantics<parallel>, #tpu.dimension_semantics<arbitrary>], iteration_bounds = array<i64: 1, 1>, scalar_prefetch = 0 : i64, scratch_operands = 1 : i64, tpu.core_type = #tpu.core_type<tc>, window_params = [{transform_indices = @transform_0, window_bounds = array<i64: 128, 1024>}, {transform_indices = @transform_1, window_bounds = array<i64: 1024, 128>}, {pipeline_mode = #tpu.pipeline_mode<synchronous>, transform_indices = @transform_2, window_bounds = array<i64: 1, 128>}, {pipeline_mode = #tpu.pipeline_mode<synchronous>, transform_indices = @transform_3, window_bounds = array<i64: 128, 128>}, {pipeline_mode = #tpu.pipeline_mode<synchronous>, transform_indices = @transform_4, window_bounds = array<i64: 1, 128>}, {transform_indices = @transform_5, window_bounds = array<i64: 128, 128>}]} {
    %c0_i32 = arith.constant 0 : i32
    %0 = arith.cmpi eq, %arg1, %c0_i32 : i32
    %1 = arith.extui %0 : i1 to i32
    %c0_i32_0 = arith.constant 0 : i32
    %2 = arith.cmpi ne, %1, %c0_i32_0 : i32
    scf.if %2 {
      %cst_10 = arith.constant 0.000000e+00 : f32
      %13 = vector.broadcast %cst_10 : f32 to vector<128x128xf32>
      %c0_11 = arith.constant 0 : index
      %c0_12 = arith.constant 0 : index
      %14 = vector.load %arg8[%c0_11, %c0_12] : memref<128x128xf32, #tpu.memory_space<vmem>>, vector<128x128xf32>
      tpu.vector_store %arg8[%c0_11, %c0_12], %13 {strides = array<i32>} : memref<128x128xf32, #tpu.memory_space<vmem>>, vector<128x128xf32>,
    } else {
    }
    %c0 = arith.constant 0 : index
    %c0_1 = arith.constant 0 : index
    %3 = vector.load %arg8[%c0, %c0_1] : memref<128x128xf32, #tpu.memory_space<vmem>>, vector<128x128xf32>
    %c0_2 = arith.constant 0 : index
    %c0_3 = arith.constant 0 : index
    %4 = vector.load %arg2[%c0_2, %c0_3] : memref<128x1024xf32, #tpu.memory_space<vmem>>, vector<128x1024xf32>
    %5 = arith.truncf %4 : vector<128x1024xf32> to vector<128x1024xbf16>
    %c0_4 = arith.constant 0 : index
    %c0_5 = arith.constant 0 : index
    %6 = vector.load %arg3[%c0_4, %c0_5] : memref<1024x128xbf16, #tpu.memory_space<vmem>>, vector<1024x128xbf16>
    %cst = arith.constant dense<0.000000e+00> : vector<128x128xf32>
    %7 = tpu.matmul %5, %6, %cst {dimension_numbers = #tpu.dot_dimension_numbers<[1], [0], [0], [1], [0, 0, 1, 1], [], []>} : vector<128x1024xbf16>, vector<1024x128xbf16>, vector<128x128xf32> -> vector<128x128xf32>
    %8 = arith.addf %3, %7 : vector<128x128xf32>
    %c0_6 = arith.constant 0 : index
    %c0_7 = arith.constant 0 : index
    %9 = vector.load %arg8[%c0_6, %c0_7] : memref<128x128xf32, #tpu.memory_space<vmem>>, vector<128x128xf32>
    tpu.vector_store %arg8[%c0_6, %c0_7], %8 {strides = array<i32>} : memref<128x128xf32, #tpu.memory_space<vmem>>, vector<128x128xf32>,
    %c0_i32_8 = arith.constant 0 : i32
    %10 = arith.cmpi eq, %arg1, %c0_i32_8 : i32
    %11 = arith.extui %10 : i1 to i32
    %c0_i32_9 = arith.constant 0 : i32
    %12 = arith.cmpi ne, %11, %c0_i32_9 : i32
    scf.if %12 {
      %c0_10 = arith.constant 0 : index
      %c0_11 = arith.constant 0 : index
      %13 = vector.load %arg8[%c0_10, %c0_11] : memref<128x128xf32, #tpu.memory_space<vmem>>, vector<128x128xf32>
      %c0_12 = arith.constant 0 : index
      %c0_13 = arith.constant 0 : index
      %14 = vector.load %arg4[%c0_12, %c0_13] : memref<1x128xf32, #tpu.memory_space<vmem>>, vector<1x128xf32>
      %15 = vector.broadcast %14 : vector<1x128xf32> to vector<128x128xf32>
      %16 = arith.addf %13, %15 : vector<128x128xf32>
      %c0_14 = arith.constant 0 : index
      %c0_15 = arith.constant 0 : index
      %17 = vector.load %arg5[%c0_14, %c0_15] : memref<128x128xf32, #tpu.memory_space<vmem>>, vector<128x128xf32>
      %cst_16 = arith.constant dense<0.000000e+00> : vector<128x128xf32>
      %18 = tpu.matmul %16, %17, %cst_16 {dimension_numbers = #tpu.dot_dimension_numbers<[1], [0], [0], [1], [0, 0, 1, 1], [], []>} : vector<128x128xf32>, vector<128x128xf32>, vector<128x128xf32> -> vector<128x128xf32>
      %c0_17 = arith.constant 0 : index
      %c0_18 = arith.constant 0 : index
      %19 = vector.load %arg6[%c0_17, %c0_18] : memref<1x128xf32, #tpu.memory_space<vmem>>, vector<1x128xf32>
      %20 = vector.broadcast %19 : vector<1x128xf32> to vector<128x128xf32>
      %21 = arith.addf %18, %20 : vector<128x128xf32>
      %c0_19 = arith.constant 0 : index
      %c0_20 = arith.constant 0 : index
      %22 = vector.load %arg7[%c0_19, %c0_20] : memref<128x128xf32, #tpu.memory_space<vmem>>, vector<128x128xf32>
      tpu.vector_store %arg7[%c0_19, %c0_20], %21 {strides = array<i32>} : memref<128x128xf32, #tpu.memory_space<vmem>>, vector<128x128xf32>,
    } else {
    }
    return
  }
  func.func @transform_0(%arg0: i32, %arg1: i32) -> (i32, i32) {
    %c0_i32 = arith.constant 0 : i32
    return %arg0, %arg1 : i32, i32
  }
  func.func @transform_1(%arg0: i32, %arg1: i32) -> (i32, i32) {
    %c0_i32 = arith.constant 0 : i32
    %c0_i32_0 = arith.constant 0 : i32
    return %arg1, %c0_i32 : i32, i32
  }
  func.func @transform_2(%arg0: i32, %arg1: i32) -> (i32, i32) {
    %c0_i32 = arith.constant 0 : i32
    %c0_i32_0 = arith.constant 0 : i32
    %c0_i32_1 = arith.constant 0 : i32
    return %c0_i32, %c0_i32_0 : i32, i32
  }
  func.func @transform_3(%arg0: i32, %arg1: i32) -> (i32, i32) {
    %c0_i32 = arith.constant 0 : i32
    %c0_i32_0 = arith.constant 0 : i32
    %c0_i32_1 = arith.constant 0 : i32
    return %c0_i32, %c0_i32_0 : i32, i32
  }
  func.func @transform_4(%arg0: i32, %arg1: i32) -> (i32, i32) {
    %c0_i32 = arith.constant 0 : i32
    %c0_i32_0 = arith.constant 0 : i32
    %c0_i32_1 = arith.constant 0 : i32
    return %c0_i32, %c0_i32_0 : i32, i32
  }
  func.func @transform_5(%arg0: i32, %arg1: i32) -> (i32, i32) {
    %c0_i32 = arith.constant 0 : i32
    %c0_i32_0 = arith.constant 0 : i32
    return %arg0, %c0_i32 : i32, i32
  }
}

</mosaic_0001>

<bundles_post_ra>
// kernel: tpu_custom_call.1
= control target key start
LH: loop header
LB: loop body
LE: loop exit
PB: predicated region body
PF: predicated region fallthrough
CT: control target
= control target key end

     0   :  { %10 = vsyncpa [#allocation4], 0  ;;  %s2014_s0 = inlined_call_operand.hbm [shape: f32[128,1024], index: 0, kind: input, shape index: {}]   ;;  %s2015_s1 = inlined_call_operand.hbm [shape: bf16[1024,128], index: 1, kind: input, shape index: {}]   ;;  %s2016_s2 = inlined_call_operand.vmem [shape: f32[1,128], index: 2, kind: input, shape index: {}]   ;;  %s2017_s3 = inlined_call_operand.hbm [shape: f32[128,128], index: 3, kind: input, shape index: {}]   ;;  %s2018_s4 = inlined_call_operand.vmem [shape: f32[1,128], index: 4, kind: input, shape index: {}]   ;;  %s2019_s5 = inlined_call_operand.hbm [shape: f32[128,128], index: 5, kind: output, shape index: {}]  }
   0x1   :  { %11 = vsyncpa [#allocation7], 0  ;;  %s30_s20 = sshll.u32 %s2015_s1, 4  ;;  %s31_s20 = int_to_ptr.hbm [resolvable:$true] %s30_s20 }
   0x2   :  { %12 = vsyncpa [#allocation5], 0  ;;  %s1849_s21 = smov [#allocation6]   ;;  %s17_s25 = sshll.u32 %s2014_s0, 4  ;;  %s18_s25 = int_to_ptr.hbm [resolvable:$true] %s17_s25 }
   0x3   :  { %s32_s22 = sshll.u32 %s1849_s21, 4  ;;  %s1850_s26 = smov 64   ;;  %s33_s22 = int_to_ptr.vmem [resolvable:$true] %s32_s22 }
   0x4   :  { %s1851_s27 = smov 4   ;;  %s1852_s28 = smov [#allocation3]  }
   0x5   :  { %38 = dma.hbm_to_vmem [thread:$0]  %s31_s20, 8192, %s33_s22, [#allocation7], %s1850_s26, %s1850_s26, %s1851_s27  }
   0x6   :  { %s19_s29 = sshll.u32 %s1852_s28, 4  ;;  %s45_s1 = sshll.u32 %s2017_s3, 4  ;;  %s20_s29 = int_to_ptr.vmem [resolvable:$true] %s19_s29  ;;  %s46_s1 = int_to_ptr.hbm [resolvable:$true] %s45_s1 }
   0x7   :  { %s1853_s7 = smov 1024   ;;  %s1854_s8 = smov [#allocation8]  }
   0x8   :  { %25 = dma.hbm_to_vmem [thread:$0]  %s18_s25, 16384, %s20_s29, [#allocation4], %s1853_s7, %s1853_s7, %s1850_s26  }
   0x9   :  { %s47_s9 = sshll.u32 %s1854_s8, 4  ;;  %s1855_s10 = smov 128   ;;  %s48_s9 = int_to_ptr.vmem [resolvable:$true] %s47_s9 }
   0xa   :  { %s1856_s11 = smov 8  }
   0xb   :  { %53 = dma.hbm_to_vmem [thread:$0]  %s46_s1, 2048, %s48_s9, [#allocation7], %s1855_s10, %s1855_s10, %s1856_s11  }
   0xc   :  { %1843 = dma.done.wait [#allocation4], 16384  }
   0xd   :  { %1844 = vsyncadd [#allocation4], 4294950912 }
   0xe   :  { %1845 = dma.done.wait [#allocation7], 10240  }
   0xf   :  { %1846 = vsyncadd [#allocation7], 4294957056  ;;  %v1655_v0 = vld [vmem:[#allocation6 + $0x38] sm:$0xff]  ;;  %v1654_v1 = vld [vmem:[#allocation6 + $0x30] sm:$0xff]  ;;  %s1378_s16 = sshll.u32 %s2019_s5, 4  ;;  %s1379_s16 = int_to_ptr.hbm [resolvable:$true] %s1378_s16 }
  0x10   :  { %1712 = vmatpush.bf16.msra.mxu1 %v1655_v0  ;;  %1713 = vmatpush.bf16.msra.mxu2 %v1655_v0  ;;  %v1653_v2 = vld [vmem:[#allocation6 + $0x28] sm:$0xff]  ;;  %v1652_v3 = vld [vmem:[#allocation6 + $0x20] sm:$0xff]  ;;  %v1651_v4 = vld [vmem:[#allocation6 + $0x18] sm:$0xff] }
  0x11   :  { %1714 = vmatpush.bf16.msra.mxu3 %v1655_v0  ;;  %808 = vmatpush.bf16.msra.mxu0 %v1655_v0  ;;  %v1650_v5 = vld [vmem:[#allocation6 + $0x10] sm:$0xff]  ;;  %v1649_v6 = vld [vmem:[#allocation6 + $0x8] sm:$0xff]  ;;  %v1648_v7 = vld [vmem:[#allocation6] sm:$0xff] }
  0x12   :  { %v136_v8 = vld [vmem:[#allocation3 + $0x100] sm:$0xff]  ;;  %v1671_v14 = vld [vmem:[#allocation6 + $0xb8] sm:$0xff]  ;;  %v1670_v22 = vld [vmem:[#allocation6 + $0xb0] sm:$0xff] }
  0x13   :  { %v144_v9 = vld [vmem:[#allocation3 + $0x140] sm:$0xff]  ;;  %v1663_v15 = vld [vmem:[#allocation6 + $0x78] sm:$0xff]  ;;  %v1662_v24 = vld [vmem:[#allocation6 + $0x70] sm:$0xff] }
  0x14   :  { %1715 = vmatpush.bf16.msra.mxu1 %v1654_v1  ;;  %1716 = vmatpush.bf16.msra.mxu2 %v1654_v1  ;;  %v168_v10 = vld [vmem:[#allocation3 + $0x200] sm:$0xff]  ;;  %v1679_v16 = vld [vmem:[#allocation6 + $0xf8] sm:$0xff]  ;;  %v248_v17 = vpack.c.bf16 %v144_v9, %v136_v8  ;;  %v1678_v25 = vld [vmem:[#allocation6 + $0xf0] sm:$0xff] }
  0x15   :  { %1717 = vmatpush.bf16.msra.mxu3 %v1654_v1  ;;  %809 = vmatpush.bf16.msra.mxu0 %v1654_v1  ;;  %v176_v11 = vld [vmem:[#allocation3 + $0x240] sm:$0xff]  ;;  %v1687_v23 = vld [vmem:[#allocation6 + $0x138] sm:$0xff]  ;;  %v1669_v27 = vld [vmem:[#allocation6 + $0xa8] sm:$0xff] }
  0x16   :  { %v200_v12 = vld [vmem:[#allocation3 + $0x300] sm:$0xff]  ;;  %v264_v18 = vpack.c.bf16 %v176_v11, %v168_v10  ;;  %v1686_v28 = vld [vmem:[#allocation6 + $0x130] sm:$0xff]  ;;  %v1661_v29 = vld [vmem:[#allocation6 + $0x68] sm:$0xff] }
  0x17   :  { %v208_v13 = vld [vmem:[#allocation3 + $0x340] sm:$0xff]  ;;  %v1677_v30 = vld [vmem:[#allocation6 + $0xe8] sm:$0xff]  ;;  %v1667_v41 = vld [vmem:[#allocation6 + $0x98] sm:$0xff] }
  0x18   :  { %1718 = vmatpush.bf16.msra.mxu1 %v1653_v2  ;;  %1719 = vmatpush.bf16.msra.mxu2 %v1653_v2  ;;  %v280_v19 = vpack.c.bf16 %v208_v13, %v200_v12  ;;  %v104_v20 = vld [vmem:[#allocation3] sm:$0xff]  ;;  %v1685_v32 = vld [vmem:[#allocation6 + $0x128] sm:$0xff]  ;;  %v1659_v43 = vld [vmem:[#allocation6 + $0x58] sm:$0xff] }
  0x19   :  { %1720 = vmatpush.bf16.msra.mxu3 %v1653_v2  ;;  %810 = vmatpush.bf16.msra.mxu0 %v1653_v2  ;;  %v112_v21 = vld [vmem:[#allocation3 + $0x40] sm:$0xff]  ;;  %v1675_v44 = vld [vmem:[#allocation6 + $0xd8] sm:$0xff]  ;;  %v1666_v50 = vld [vmem:[#allocation6 + $0x90] sm:$0xff] }
  0x1a   :  { %v232_v26 = vpack.c.bf16 %v112_v21, %v104_v20  ;;  %v1668_v31 = vld [vmem:[#allocation6 + $0xa0] sm:$0xff]  ;;  %v1683_v51 = vld [vmem:[#allocation6 + $0x118] sm:$0xff]  ;;  %v1658_v52 = vld [vmem:[#allocation6 + $0x50] sm:$0xff] }
  0x1b   :  { %v1660_v33 = vld [vmem:[#allocation6 + $0x60] sm:$0xff]  ;;  %v1674_v53 = vld [vmem:[#allocation6 + $0xd0] sm:$0xff]  ;;  %v1665_v55 = vld [vmem:[#allocation6 + $0x88] sm:$0xff] }
  0x1c   :  { %1721 = vmatpush.bf16.msra.mxu1 %v1652_v3  ;;  %1722 = vmatpush.bf16.msra.mxu2 %v1652_v3  ;;  %v1676_v34 = vld [vmem:[#allocation6 + $0xe0] sm:$0xff]  ;;  %v1682_v56 = vld [vmem:[#allocation6 + $0x110] sm:$0xff]  ;;  %v1657_v57 = vld [vmem:[#allocation6 + $0x48] sm:$0xff] }
  0x1d   :  { %1723 = vmatpush.bf16.msra.mxu3 %v1652_v3  ;;  %811 = vmatpush.bf16.msra.mxu0 %v1652_v3  ;;  %v152_v35 = vld [vmem:[#allocation3 + $0x180] sm:$0xff]  ;;  %v1673_v58 = vld [vmem:[#allocation6 + $0xc8] sm:$0xff]  ;;  %v1703_v1 = vld [vmem:[#allocation6 + $0x1b8] sm:$0xff] }
  0x1e   :  { %v160_v36 = vld [vmem:[#allocation3 + $0x1c0] sm:$0xff]  ;;  %v1681_v60 = vld [vmem:[#allocation6 + $0x108] sm:$0xff]  ;;  %v1711_v2 = vld [vmem:[#allocation6 + $0x1f8] sm:$0xff] }
  0x1f   :  { %v184_v37 = vld [vmem:[#allocation3 + $0x280] sm:$0xff]  ;;  %v256_v45 = vpack.c.bf16 %v160_v36, %v152_v35  ;;  %v105_v63 = vld [vmem:[#allocation3 + $0x8] sm:$0xff]  ;;  %v106_v3 = vld [vmem:[#allocation3 + $0x10] sm:$0xff] }
  0x20   :  { %1724 = vmatpush.bf16.msra.mxu1 %v1651_v4  ;;  %1725 = vmatpush.bf16.msra.mxu2 %v1651_v4  ;;  %v192_v38 = vld [vmem:[#allocation3 + $0x2c0] sm:$0xff]  ;;  %v113_v0 = vld [vmem:[#allocation3 + $0x48] sm:$0xff] }
  0x21   :  { %1726 = vmatpush.bf16.msra.mxu3 %v1651_v4  ;;  %812 = vmatpush.bf16.msra.mxu0 %v1651_v4  ;;  %v216_v39 = vld [vmem:[#allocation3 + $0x380] sm:$0xff]  ;;  %v272_v46 = vpack.c.bf16 %v192_v38, %v184_v37  ;;  %v114_v4 = vld [vmem:[#allocation3 + $0x50] sm:$0xff]  ;;  %v233_v9 = vpack.c.bf16 %v113_v0, %v105_v63  ;;  %v1693_v20 = vld [vmem:[#allocation6 + $0x168] sm:$0xff] }
  0x22   :  { %v224_v40 = vld [vmem:[#allocation3 + $0x3c0] sm:$0xff]  ;;  %v234_v10 = vpack.c.bf16 %v114_v4, %v106_v3  ;;  %v121_v21 = vld [vmem:[#allocation3 + $0x88] sm:$0xff]  ;;  %v138_v38 = vld [vmem:[#allocation3 + $0x110] sm:$0xff] }
  0x23   :  { %v1684_v42 = vld [vmem:[#allocation6 + $0x120] sm:$0xff]  ;;  %v288_v47 = vpack.c.bf16 %v224_v40, %v216_v39  ;;  %v137_v36 = vld [vmem:[#allocation3 + $0x108] sm:$0xff]  ;;  %v146_v39 = vld [vmem:[#allocation3 + $0x150] sm:$0xff] }
  0x24   :  { %1727 = vmatpush.bf16.msra.mxu1 %v1650_v5  ;;  %1728 = vmatpush.bf16.msra.mxu2 %v1650_v5  ;;  %v120_v48 = vld [vmem:[#allocation3 + $0x80] sm:$0xff]  ;;  %v145_v37 = vld [vmem:[#allocation3 + $0x148] sm:$0xff]  ;;  %v139_v40 = vld [vmem:[#allocation3 + $0x118] sm:$0xff] }
  0x25   :  { %1729 = vmatpush.bf16.msra.mxu3 %v1650_v5  ;;  %813 = vmatpush.bf16.msra.mxu0 %v1650_v5  ;;  %v128_v49 = vld [vmem:[#allocation3 + $0xc0] sm:$0xff]  ;;  %v1695_v5 = vld [vmem:[#allocation6 + $0x178] sm:$0xff]  ;;  %v1698_v63 = vld [vmem:[#allocation6 + $0x190] sm:$0xff] }
  0x26   :  { %v240_v54 = vpack.c.bf16 %v128_v49, %v120_v48  ;;  %v1664_v59 = vld [vmem:[#allocation6 + $0x80] sm:$0xff]  ;;  %v1699_v48 = vld [vmem:[#allocation6 + $0x198] sm:$0xff]  ;;  %v1706_v0 = vld [vmem:[#allocation6 + $0x1d0] sm:$0xff] }
  0x27   :  { %v1656_v61 = vld [vmem:[#allocation6 + $0x40] sm:$0xff]  ;;  %v1707_v49 = vld [vmem:[#allocation6 + $0x1d8] sm:$0xff]  ;;  %v177_v3 = vld [vmem:[#allocation3 + $0x248] sm:$0xff] }
  0x28   :  { %1730 = vmatpush.bf16.msra.mxu1 %v1649_v6  ;;  %1731 = vmatpush.bf16.msra.mxu2 %v1649_v6  ;;  %v1672_v62 = vld [vmem:[#allocation6 + $0xc0] sm:$0xff]  ;;  %v170_v4 = vld [vmem:[#allocation3 + $0x210] sm:$0xff] }
  0x29   :  { %1732 = vmatpush.bf16.msra.mxu3 %v1649_v6  ;;  %814 = vmatpush.bf16.msra.mxu0 %v1649_v6  ;;  %v107_v6 = vld [vmem:[#allocation3 + $0x18] sm:$0xff]  ;;  %v1680_v8 = vld [vmem:[#allocation6 + $0x100] sm:$0xff] }
  0x2a   :  { %v108_v12 = vld [vmem:[#allocation3 + $0x20] sm:$0xff] }
  0x2b   :  { %v116_v13 = vld [vmem:[#allocation3 + $0x60] sm:$0xff] }
  0x2c   :  { %1733 = vmatpush.bf16.msra.mxu1 %v1648_v7  ;;  %1734 = vmatpush.bf16.msra.mxu2 %v1648_v7  ;;  %v1692_v35 = vld [vmem:[#allocation6 + $0x160] sm:$0xff] }
  0x2d   :  { %1735 = vmatpush.bf16.msra.mxu3 %v1648_v7  ;;  %815 = vmatpush.bf16.msra.mxu0 %v1648_v7  ;;  %v115_v7 = vld [vmem:[#allocation3 + $0x58] sm:$0xff] }
  0x2e   :  { %v235_v11 = vpack.c.bf16 %v115_v7, %v107_v6  ;;  %v171_v6 = vld [vmem:[#allocation3 + $0x218] sm:$0xff] }
  0x2f   :  { %826 = vmatmul.bf16.vlgmr.msra.gmra.mxu1 %v248_v17  ;;  %836 = vmatmul.bf16.vlgmr.msra.gmra.mxu2 %v264_v18  ;;  %v236_v17 = vpack.c.bf16 %v116_v13, %v108_v12  ;;  %v1701_v18 = vld [vmem:[#allocation6 + $0x1a8] sm:$0xff]  ;;  %v179_v7 = vld [vmem:[#allocation3 + $0x258] sm:$0xff]  ;;  %v180_v12 = vld [vmem:[#allocation3 + $0x260] sm:$0xff] }
  0x30   :  { %906 = vmatpush.bf16.msrb.mxu2 %v1671_v14  ;;  %857 = vmatpush.bf16.msrb.mxu1 %v1663_v15  ;;  %v1702_v14 = vld [vmem:[#allocation6 + $0x1b0] sm:$0xff] }
  0x31   :  { %955 = vmatpush.bf16.msrb.mxu3 %v1679_v16  ;;  %1004 = vmatpush.bf16.msrb.mxu0 %v1687_v23  ;;  %v1710_v15 = vld [vmem:[#allocation6 + $0x1f0] sm:$0xff] }
  0x32   :  { %846 = vmatmul.bf16.vlgmr.msra.gmra.mxu3 %v280_v19  ;;  %816 = vmatmul.bf16.vlgmr.msra.gmra.mxu0 %v232_v26  ;;  %v1694_v16 = vld [vmem:[#allocation6 + $0x170] sm:$0xff]  ;;  %v1709_v19 = vld [vmem:[#allocation6 + $0x1e8] sm:$0xff]  ;;  %v131_v26 = vld [vmem:[#allocation3 + $0xd8] sm:$0xff] }
  0x33   :  { %v122_v23 = vld [vmem:[#allocation3 + $0x90] sm:$0xff] }
  0x34   :  { %907 = vmatpush.bf16.msrb.mxu2 %v1670_v22  ;;  %858 = vmatpush.bf16.msrb.mxu1 %v1662_v24  ;;  %v129_v22 = vld [vmem:[#allocation3 + $0xc8] sm:$0xff]  ;;  %v130_v24 = vld [vmem:[#allocation3 + $0xd0] sm:$0xff] }
  0x35   :  { %956 = vmatpush.bf16.msrb.mxu3 %v1678_v25  ;;  %1005 = vmatpush.bf16.msrb.mxu0 %v1686_v28  ;;  %v123_v25 = vld [vmem:[#allocation3 + $0x98] sm:$0xff]  ;;  %v242_v28 = vpack.c.bf16 %v130_v24, %v122_v23 }
  0x38   :  { %908 = vmatpush.bf16.msrb.mxu2 %v1669_v27  ;;  %859 = vmatpush.bf16.msrb.mxu1 %v1661_v29  ;;  %v241_v27 = vpack.c.bf16 %v129_v22, %v121_v21  ;;  %v243_v29 = vpack.c.bf16 %v131_v26, %v123_v25  ;;  %v187_v21 = vld [vmem:[#allocation3 + $0x298] sm:$0xff]  ;;  %v188_v26 = vld [vmem:[#allocation3 + $0x2a0] sm:$0xff] }
  0x39   :  { %957 = vmatpush.bf16.msrb.mxu3 %v1677_v30  ;;  %1006 = vmatpush.bf16.msrb.mxu0 %v1685_v32  ;;  %v124_v30 = vld [vmem:[#allocation3 + $0xa0] sm:$0xff]  ;;  %v195_v22 = vld [vmem:[#allocation3 + $0x2d8] sm:$0xff] }
  0x3a   :  { %v275_v25 = vpack.c.bf16 %v195_v22, %v187_v21 }
  0x3c   :  { %909 = vmatpush.bf16.msrb.mxu2 %v1668_v31  ;;  %860 = vmatpush.bf16.msrb.mxu1 %v1660_v33  ;;  %v132_v31 = vld [vmem:[#allocation3 + $0xe0] sm:$0xff] }
  0x3d   :  { %958 = vmatpush.bf16.msrb.mxu3 %v1676_v34  ;;  %1007 = vmatpush.bf16.msrb.mxu0 %v1684_v42  ;;  %v244_v32 = vpack.c.bf16 %v132_v31, %v124_v30  ;;  %v1700_v33 = vld [vmem:[#allocation6 + $0x1a0] sm:$0xff]  ;;  %v249_v42 = vpack.c.bf16 %v145_v37, %v137_v36  ;;  %v203_v36 = vld [vmem:[#allocation3 + $0x318] sm:$0xff] }
  0x3e   :  { %v1708_v34 = vld [vmem:[#allocation6 + $0x1e0] sm:$0xff]  ;;  %v211_v37 = vld [vmem:[#allocation3 + $0x358] sm:$0xff] }
  0x3f   :  { %831 = vmatmul.bf16.gmra.mxu1 %v256_v45  ;;  %841 = vmatmul.bf16.gmra.mxu2 %v272_v46  ;;  %v140_v45 = vld [vmem:[#allocation3 + $0x120] sm:$0xff] }
  0x40   :  { %910 = vmatpush.bf16.msrb.mxu2 %v1667_v41  ;;  %861 = vmatpush.bf16.msrb.mxu1 %v1659_v43  ;;  %v147_v41 = vld [vmem:[#allocation3 + $0x158] sm:$0xff]  ;;  %v250_v43 = vpack.c.bf16 %v146_v39, %v138_v38  ;;  %v148_v46 = vld [vmem:[#allocation3 + $0x160] sm:$0xff] }
  0x41   :  { %959 = vmatpush.bf16.msrb.mxu3 %v1675_v44  ;;  %1008 = vmatpush.bf16.msrb.mxu0 %v1683_v51  ;;  %v251_v44 = vpack.c.bf16 %v147_v41, %v139_v40  ;;  %v153_v51 = vld [vmem:[#allocation3 + $0x188] sm:$0xff]  ;;  %v1704_v30 = vld [vmem:[#allocation6 + $0x1c0] sm:$0xff]  ;;  %v283_v41 = vpack.c.bf16 %v211_v37, %v203_v36 }
  0x42   :  { %851 = vmatmul.bf16.gmra.mxu3 %v288_v47  ;;  %821 = vmatmul.bf16.gmra.mxu0 %v240_v54  ;;  %v252_v47 = vpack.c.bf16 %v148_v46, %v140_v45  ;;  %v162_v54 = vld [vmem:[#allocation3 + $0x1d0] sm:$0xff]  ;;  %v1688_v31 = vld [vmem:[#allocation6 + $0x140] sm:$0xff] }
  0x44   :  { %911 = vmatpush.bf16.msrb.mxu2 %v1666_v50  ;;  %862 = vmatpush.bf16.msrb.mxu1 %v1658_v52  ;;  %v1691_v50 = vld [vmem:[#allocation6 + $0x158] sm:$0xff]  ;;  %v161_v52 = vld [vmem:[#allocation3 + $0x1c8] sm:$0xff] }
  0x45   :  { %960 = vmatpush.bf16.msrb.mxu3 %v1674_v53  ;;  %1009 = vmatpush.bf16.msrb.mxu0 %v1682_v56  ;;  %v154_v53 = vld [vmem:[#allocation3 + $0x190] sm:$0xff]  ;;  %v163_v56 = vld [vmem:[#allocation3 + $0x1d8] sm:$0xff] }
  0x48   :  { %912 = vmatpush.bf16.msrb.mxu2 %v1665_v55  ;;  %863 = vmatpush.bf16.msrb.mxu1 %v1657_v57  ;;  %v155_v55 = vld [vmem:[#allocation3 + $0x198] sm:$0xff]  ;;  %v257_v57 = vpack.c.bf16 %v161_v52, %v153_v51  ;;  %v218_v51 = vld [vmem:[#allocation3 + $0x390] sm:$0xff] }
  0x49   :  { %961 = vmatpush.bf16.msrb.mxu3 %v1673_v58  ;;  %1010 = vmatpush.bf16.msrb.mxu0 %v1681_v60  ;;  %v258_v58 = vpack.c.bf16 %v162_v54, %v154_v53  ;;  %v156_v60 = vld [vmem:[#allocation3 + $0x1a0] sm:$0xff]  ;;  %v226_v52 = vld [vmem:[#allocation3 + $0x3d0] sm:$0xff]  ;;  %v219_v53 = vld [vmem:[#allocation3 + $0x398] sm:$0xff] }
  0x4a   :  { %v227_v54 = vld [vmem:[#allocation3 + $0x3d8] sm:$0xff] }
  0x4c   :  { %913 = vmatpush.bf16.msrb.mxu2 %v1664_v59  ;;  %864 = vmatpush.bf16.msrb.mxu1 %v1656_v61  ;;  %v259_v59 = vpack.c.bf16 %v163_v56, %v155_v55  ;;  %v164_v61 = vld [vmem:[#allocation3 + $0x1e0] sm:$0xff] }
  0x4d   :  { %962 = vmatpush.bf16.msrb.mxu3 %v1672_v62  ;;  %1011 = vmatpush.bf16.msrb.mxu0 %v1680_v8  ;;  %v260_v62 = vpack.c.bf16 %v164_v61, %v156_v60  ;;  %v291_v60 = vpack.c.bf16 %v227_v54, %v219_v53  ;;  %v220_v61 = vld [vmem:[#allocation3 + $0x3a0] sm:$0xff]  ;;  %v141_v54 = vld [vmem:[#allocation3 + $0x128] sm:$0xff] }
  0x4f   :  { %865 = vmatmul.bf16.vlgmr.msrb.gmra.mxu1 %v233_v9  ;;  %914 = vmatmul.bf16.vlgmr.msrb.gmra.mxu2 %v234_v10  ;;  %v267_v10 = vpack.c.bf16 %v179_v7, %v171_v6  ;;  %v117_v6 = vld [vmem:[#allocation3 + $0x68] sm:$0xff]  ;;  %v110_v7 = vld [vmem:[#allocation3 + $0x30] sm:$0xff] }
  0x50   :  { %1102 = vmatpush.bf16.msra.mxu2 %v1703_v1  ;;  %1053 = vmatpush.bf16.msra.mxu1 %v1695_v5  ;;  %v1690_v1 = vld [vmem:[#allocation6 + $0x150] sm:$0xff] }
  0x51   :  { %1151 = vmatpush.bf16.msra.mxu3 %v1711_v2  ;;  %v169_v2 = vld [vmem:[#allocation3 + $0x208] sm:$0xff]  ;;  %v178_v5 = vld [vmem:[#allocation3 + $0x250] sm:$0xff] }
  0x52   :  { %963 = vmatmul.bf16.vlgmr.msrb.gmra.mxu3 %v235_v11  ;;  %1012 = vmatmul.bf16.vlgmr.msrb.gmra.mxu0 %v236_v17  ;;  %v265_v8 = vpack.c.bf16 %v177_v3, %v169_v2  ;;  %v266_v9 = vpack.c.bf16 %v178_v5, %v170_v4  ;;  %v172_v11 = vld [vmem:[#allocation3 + $0x220] sm:$0xff]  ;;  %v185_v17 = vld [vmem:[#allocation3 + $0x288] sm:$0xff] }
  0x53   :  { %v268_v13 = vpack.c.bf16 %v180_v12, %v172_v11  ;;  %v109_v4 = vld [vmem:[#allocation3 + $0x28] sm:$0xff] }
  0x54   :  { %1103 = vmatpush.bf16.msra.mxu2 %v1702_v14  ;;  %1054 = vmatpush.bf16.msra.mxu1 %v1694_v16  ;;  %v1697_v14 = vld [vmem:[#allocation6 + $0x188] sm:$0xff] }
  0x55   :  { %1152 = vmatpush.bf16.msra.mxu3 %v1710_v15  ;;  %v1705_v15 = vld [vmem:[#allocation6 + $0x1c8] sm:$0xff] }
  0x56   :  { %v1689_v16 = vld [vmem:[#allocation6 + $0x148] sm:$0xff] }
  0x57   :  { %v1284_v5 = vld [vmem:[#allocation8 + $0x68] sm:$0xff] }
  0x58   :  { %1104 = vmatpush.bf16.msra.mxu2 %v1701_v18  ;;  %1055 = vmatpush.bf16.msra.mxu1 %v1693_v20  ;;  %v193_v18 = vld [vmem:[#allocation3 + $0x2c8] sm:$0xff]  ;;  %v194_v20 = vld [vmem:[#allocation3 + $0x2d0] sm:$0xff] }
  0x59   :  { %1153 = vmatpush.bf16.msra.mxu3 %v1709_v19  ;;  %v186_v19 = vld [vmem:[#allocation3 + $0x290] sm:$0xff]  ;;  %v273_v23 = vpack.c.bf16 %v193_v18, %v185_v17 }
  0x5a   :  { %v274_v24 = vpack.c.bf16 %v194_v20, %v186_v19  ;;  %v1283_v19 = vld [vmem:[#allocation8 + $0x60] sm:$0xff] }
  0x5c   :  { %1105 = vmatpush.bf16.msra.mxu2 %v1700_v33  ;;  %1056 = vmatpush.bf16.msra.mxu1 %v1692_v35  ;;  %v209_v33 = vld [vmem:[#allocation3 + $0x348] sm:$0xff]  ;;  %v210_v35 = vld [vmem:[#allocation3 + $0x350] sm:$0xff] }
  0x5d   :  { %1154 = vmatpush.bf16.msra.mxu3 %v1708_v34  ;;  %v202_v34 = vld [vmem:[#allocation3 + $0x310] sm:$0xff] }
  0x5e   :  { %v282_v39 = vpack.c.bf16 %v210_v35, %v202_v34 }
  0x5f   :  { %870 = vmatmul.bf16.gmra.mxu1 %v241_v27  ;;  %919 = vmatmul.bf16.gmra.mxu2 %v242_v28  ;;  %v196_v27 = vld [vmem:[#allocation3 + $0x2e0] sm:$0xff] }
  0x60   :  { %1106 = vmatpush.bf16.msra.mxu2 %v1699_v48  ;;  %1057 = vmatpush.bf16.msra.mxu1 %v1691_v50  ;;  %v276_v28 = vpack.c.bf16 %v196_v27, %v188_v26  ;;  %v217_v48 = vld [vmem:[#allocation3 + $0x388] sm:$0xff]  ;;  %v1282_v27 = vld [vmem:[#allocation8 + $0x58] sm:$0xff] }
  0x61   :  { %1155 = vmatpush.bf16.msra.mxu3 %v1707_v49  ;;  %v1286_v49 = vld [vmem:[#allocation8 + $0x78] sm:$0xff]  ;;  %v225_v50 = vld [vmem:[#allocation3 + $0x3c8] sm:$0xff] }
  0x62   :  { %968 = vmatmul.bf16.gmra.mxu3 %v243_v29  ;;  %1017 = vmatmul.bf16.gmra.mxu0 %v244_v32  ;;  %v1696_v29 = vld [vmem:[#allocation6 + $0x180] sm:$0xff]  ;;  %v201_v32 = vld [vmem:[#allocation3 + $0x308] sm:$0xff] }
  0x63   :  { %v281_v38 = vpack.c.bf16 %v209_v33, %v201_v32  ;;  %1291 = vmatpush.msra.mxu0 %v1286_v49  ;;  %v125_v26 = vld [vmem:[#allocation3 + $0xa8] sm:$0xff]  ;;  %v127_v32 = vld [vmem:[#allocation3 + $0xb8] sm:$0xff] }
  0x64   :  { %1107 = vmatpush.bf16.msra.mxu2 %v1698_v63  ;;  %1058 = vmatpush.bf16.msra.mxu1 %v1690_v1  ;;  %v135_v33 = vld [vmem:[#allocation3 + $0xf8] sm:$0xff] }
  0x65   :  { %1156 = vmatpush.bf16.msra.mxu3 %v1706_v0  ;;  %v1285_v0 = vld [vmem:[#allocation8 + $0x70] sm:$0xff] }
  0x66   :  { %1292 = vmatpush.msra.mxu0 %v1285_v0  ;;  %v143_v0 = vld [vmem:[#allocation3 + $0x138] sm:$0xff] }
  0x68   :  { %1108 = vmatpush.bf16.msra.mxu2 %v1697_v14  ;;  %1059 = vmatpush.bf16.msra.mxu1 %v1689_v16  ;;  %v237_v14 = vpack.c.bf16 %v117_v6, %v109_v4  ;;  %v151_v4 = vld [vmem:[#allocation3 + $0x178] sm:$0xff] }
  0x69   :  { %1157 = vmatpush.bf16.msra.mxu3 %v1705_v15  ;;  %1293 = vmatpush.msra.mxu0 %v1284_v5 }
  0x6b   :  { %1294 = vmatpush.msra.mxu0 %v1283_v19 }
  0x6c   :  { %1109 = vmatpush.bf16.msra.mxu2 %v1696_v29  ;;  %1060 = vmatpush.bf16.msra.mxu1 %v1688_v31  ;;  %v126_v29 = vld [vmem:[#allocation3 + $0xb0] sm:$0xff] }
  0x6d   :  { %1158 = vmatpush.bf16.msra.mxu3 %v1704_v30  ;;  %v134_v30 = vld [vmem:[#allocation3 + $0xf0] sm:$0xff]  ;;  %1295 = vmatpush.msra.mxu0 %v1282_v27 }
  0x6e   :  { %v158_v27 = vld [vmem:[#allocation3 + $0x1b0] sm:$0xff] }
  0x6f   :  { %875 = vmatmul.bf16.gmra.mxu1 %v249_v42  ;;  %924 = vmatmul.bf16.gmra.mxu2 %v250_v43  ;;  %v204_v42 = vld [vmem:[#allocation3 + $0x320] sm:$0xff] }
  0x70   :  { %v212_v43 = vld [vmem:[#allocation3 + $0x360] sm:$0xff] }
  0x72   :  { %973 = vmatmul.bf16.gmra.mxu3 %v251_v44  ;;  %1022 = vmatmul.bf16.gmra.mxu0 %v252_v47  ;;  %v284_v44 = vpack.c.bf16 %v212_v43, %v204_v42 }
  0x7f   :  { %880 = vmatmul.bf16.gmra.mxu1 %v257_v57  ;;  %929 = vmatmul.bf16.gmra.mxu2 %v258_v58  ;;  %v289_v57 = vpack.c.bf16 %v225_v50, %v217_v48  ;;  %v290_v58 = vpack.c.bf16 %v226_v52, %v218_v51  ;;  %v1281_v48 = vld [vmem:[#allocation8 + $0x50] sm:$0xff] }
  0x80   :  { %1296 = vmatpush.msra.mxu0 %v1281_v48 }
  0x82   :  { %978 = vmatmul.bf16.gmra.mxu3 %v259_v59  ;;  %1027 = vmatmul.bf16.gmra.mxu0 %v260_v62  ;;  %v228_v62 = vld [vmem:[#allocation3 + $0x3e0] sm:$0xff] }
  0x83   :  { %v292_v63 = vpack.c.bf16 %v228_v62, %v220_v61  ;;  %v142_v61 = vld [vmem:[#allocation3 + $0x130] sm:$0xff] }
  0x84   :  { %v150_v62 = vld [vmem:[#allocation3 + $0x170] sm:$0xff] }
  0x8f   :  { %885 = vmatmul.bf16.gmra.mxu1 %v265_v8  ;;  %934 = vmatmul.bf16.gmra.mxu2 %v266_v9  ;;  %v118_v8 = vld [vmem:[#allocation3 + $0x70] sm:$0xff]  ;;  %v111_v9 = vld [vmem:[#allocation3 + $0x38] sm:$0xff] }
  0x90   :  { %v238_v15 = vpack.c.bf16 %v118_v8, %v110_v7 }
  0x92   :  { %983 = vmatmul.bf16.gmra.mxu3 %v267_v10  ;;  %1032 = vmatmul.bf16.gmra.mxu0 %v268_v13  ;;  %v119_v10 = vld [vmem:[#allocation3 + $0x78] sm:$0xff] }
  0x93   :  { %v239_v17 = vpack.c.bf16 %v119_v10, %v111_v9  ;;  %v254_v9 = vpack.c.bf16 %v150_v62, %v142_v61 }
  0x9f   :  { %890 = vmatmul.bf16.gmra.mxu1 %v273_v23  ;;  %939 = vmatmul.bf16.gmra.mxu2 %v274_v24 }
  0xa2   :  { %988 = vmatmul.bf16.gmra.mxu3 %v275_v25  ;;  %1037 = vmatmul.bf16.gmra.mxu0 %v276_v28  ;;  %v133_v28 = vld [vmem:[#allocation3 + $0xe8] sm:$0xff] }
  0xa3   :  { %v245_v37 = vpack.c.bf16 %v133_v28, %v125_v26  ;;  %v165_v26 = vld [vmem:[#allocation3 + $0x1e8] sm:$0xff]  ;;  %v166_v28 = vld [vmem:[#allocation3 + $0x1f0] sm:$0xff] }
  0xac   :  { %v1900_v40 = vpop.f32.mrf.mxu1 }
  0xaf   :  { %895 = vmatmul.bf16.gmra.mxu1 %v281_v38  ;;  %944 = vmatmul.bf16.gmra.mxu2 %v282_v39  ;;  %v817_v11 = vpop.f32.mrf.mxu0  ;;  %v246_v38 = vpack.c.bf16 %v134_v30, %v126_v29  ;;  %v167_v29 = vld [vmem:[#allocation3 + $0x1f8] sm:$0xff] }
  0xb2   :  { %993 = vmatmul.bf16.gmra.mxu3 %v283_v41  ;;  %v1902_v45 = vpop.f32.mrf.mxu2  ;;  %1042 = vmatmul.bf16.gmra.mxu0 %v284_v44  ;;  %v247_v41 = vpack.c.bf16 %v135_v33, %v127_v32 }
  0xb4   :  { %v1906_v47 = vpop.f32.mrf.mxu1 }
  0xb5   :  { %v1904_v46 = vpop.f32.mrf.mxu3 }
  0xb7   :  { %v819_v23 = vpop.f32.mrf.mxu0 }
  0xba   :  { %v1908_v55 = vpop.f32.mrf.mxu2 }
  0xbc   :  { %v1912_v59 = vpop.f32.mrf.mxu1 }
  0xbd   :  { %v1910_v56 = vpop.f32.mrf.mxu3 }
  0xbf   :  { %900 = vmatmul.bf16.gmra.mxu1 %v289_v57  ;;  %949 = vmatmul.bf16.gmra.mxu2 %v290_v58  ;;  %v822_v43 = vpop.f32.mrf.mxu0  ;;  %v1280_v57 = vld [vmem:[#allocation8 + $0x48] sm:$0xff] }
  0xc0   :  { %1297 = vmatpush.msra.mxu0 %v1280_v57  ;;  %v182_v57 = vld [vmem:[#allocation3 + $0x270] sm:$0xff] }
  0xc2   :  { %998 = vmatmul.bf16.gmra.mxu3 %v291_v60  ;;  %v1914_v1 = vpop.f32.mrf.mxu2  ;;  %1047 = vmatmul.bf16.gmra.mxu0 %v292_v63  ;;  %v149_v60 = vld [vmem:[#allocation3 + $0x168] sm:$0xff] }
  0xc3   :  { %v253_v8 = vpack.c.bf16 %v149_v60, %v141_v54  ;;  %v174_v54 = vld [vmem:[#allocation3 + $0x230] sm:$0xff] }
  0xc4   :  { %v1918_v3 = vpop.f32.mrf.mxu1 }
  0xc5   :  { %v1916_v2 = vpop.f32.mrf.mxu3 }
  0xc7   :  { %v824_v58 = vpop.f32.mrf.mxu0 }
  0xca   :  { %v1920_v12 = vpop.f32.mrf.mxu2 }
  0xcc   :  { %v866_v16 = vpop.f32.mrf.mxu1 }
  0xcd   :  { %v1922_v13 = vpop.f32.mrf.mxu3  ;;  %v867_v18 = vadd.f32 %v866_v16, %v817_v11  ;;  %v255_v11 = vpack.c.bf16 %v151_v4, %v143_v0  ;;  %v1279_v16 = vld [vmem:[#allocation8 + $0x40] sm:$0xff]  ;;  %v270_v0 = vpack.c.bf16 %v182_v57, %v174_v54 }
  0xce   :  { %1298 = vmatpush.msra.mxu0 %v1279_v16  ;;  %v189_v16 = vld [vmem:[#allocation3 + $0x2a8] sm:$0xff] }
  0xcf   :  { %1061 = vmatmul.bf16.vlgmr.msra.gmra.mxu1 %v237_v14  ;;  %1110 = vmatmul.bf16.vlgmr.msra.gmra.mxu2 %v238_v15 }
  0xd2   :  { %1159 = vmatmul.bf16.vlgmr.msra.gmra.mxu3 %v239_v17  ;;  %v915_v20 = vpop.f32.mrf.mxu2 }
  0xd3   :  { %v916_v21 = vadd.f32 %v915_v20, %v867_v18 }
  0xd4   :  { %v868_v24 = vpop.f32.mrf.mxu1 }
  0xd5   :  { %v964_v22 = vpop.f32.mrf.mxu3  ;;  %v869_v31 = vadd.f32 %v868_v24, %v819_v23  ;;  %v157_v23 = vld [vmem:[#allocation3 + $0x1a8] sm:$0xff]  ;;  %v1278_v24 = vld [vmem:[#allocation8 + $0x38] sm:$0xff] }
  0xd6   :  { %v1924_v25 = vadd.f32 %v964_v22, %v916_v21  ;;  %1299 = vmatpush.msra.mxu0 %v1278_v24  ;;  %v261_v33 = vpack.c.bf16 %v165_v26, %v157_v23  ;;  %v191_v23 = vld [vmem:[#allocation3 + $0x2b8] sm:$0xff] }
  0xd7   :  { %v199_v24 = vld [vmem:[#allocation3 + $0x2f8] sm:$0xff] }
  0xda   :  { %v917_v34 = vpop.f32.mrf.mxu2 }
  0xdb   :  { %v918_v35 = vadd.f32 %v917_v34, %v869_v31  ;;  %v262_v34 = vpack.c.bf16 %v166_v28, %v158_v27 }
  0xdc   :  { %v871_v39 = vpop.f32.mrf.mxu1 }
  0xdd   :  { %v966_v36 = vpop.f32.mrf.mxu3  ;;  %v872_v44 = vadd.f32 %v871_v39, %v822_v43 }
  0xde   :  { %v1926_v42 = vadd.f32 %v966_v36, %v918_v35 }
  0xdf   :  { %1066 = vmatmul.bf16.gmra.mxu1 %v245_v37  ;;  %1115 = vmatmul.bf16.gmra.mxu2 %v246_v38 }
  0xe2   :  { %1164 = vmatmul.bf16.gmra.mxu3 %v247_v41  ;;  %v920_v49 = vpop.f32.mrf.mxu2 }
  0xe3   :  { %v921_v50 = vadd.f32 %v920_v49, %v872_v44 }
  0xe4   :  { %v873_v52 = vpop.f32.mrf.mxu1 }
  0xe5   :  { %v969_v51 = vpop.f32.mrf.mxu3  ;;  %v874_v63 = vadd.f32 %v873_v52, %v824_v58  ;;  %v181_v52 = vld [vmem:[#allocation3 + $0x268] sm:$0xff]  ;;  %v183_v58 = vld [vmem:[#allocation3 + $0x278] sm:$0xff] }
  0xe6   :  { %v1928_v53 = vadd.f32 %v969_v51, %v921_v50  ;;  %v173_v50 = vld [vmem:[#allocation3 + $0x228] sm:$0xff] }
  0xe7   :  { %v1276_v51 = vld [vmem:[#allocation8 + $0x28] sm:$0xff] }
  0xea   :  { %v922_v5 = vpop.f32.mrf.mxu2 }
  0xeb   :  { %v923_v6 = vadd.f32 %v922_v5, %v874_v63  ;;  %v269_v63 = vpack.c.bf16 %v181_v52, %v173_v50  ;;  %v207_v50 = vld [vmem:[#allocation3 + $0x338] sm:$0xff] }
  0xec   :  { %v876_v10 = vpop.f32.mrf.mxu1 }
  0xed   :  { %v971_v7 = vpop.f32.mrf.mxu3  ;;  %v877_v15 = vadd.f32 %v876_v10, %v1900_v40  ;;  %v159_v40 = vld [vmem:[#allocation3 + $0x1b8] sm:$0xff] }
  0xee   :  { %v1930_v14 = vadd.f32 %v971_v7, %v923_v6  ;;  %v263_v36 = vpack.c.bf16 %v167_v29, %v159_v40 }
  0xef   :  { %1071 = vmatmul.bf16.gmra.mxu1 %v253_v8  ;;  %1120 = vmatmul.bf16.gmra.mxu2 %v254_v9 }
  0xf2   :  { %1169 = vmatmul.bf16.gmra.mxu3 %v255_v11  ;;  %v925_v17 = vpop.f32.mrf.mxu2 }
  0xf3   :  { %v926_v18 = vadd.f32 %v925_v17, %v877_v15  ;;  %v1274_v17 = vld [vmem:[#allocation8 + $0x18] sm:$0xff] }
  0xf4   :  { %v878_v20 = vpop.f32.mrf.mxu1 }
  0xf5   :  { %v974_v19 = vpop.f32.mrf.mxu3  ;;  %v879_v22 = vadd.f32 %v878_v20, %v1906_v47  ;;  %v1277_v47 = vld [vmem:[#allocation8 + $0x30] sm:$0xff] }
  0xf6   :  { %v1933_v21 = vadd.f32 %v974_v19, %v926_v18  ;;  %1300 = vmatpush.msra.mxu0 %v1277_v47  ;;  %v197_v18 = vld [vmem:[#allocation3 + $0x2e8] sm:$0xff]  ;;  %v190_v19 = vld [vmem:[#allocation3 + $0x2b0] sm:$0xff] }
  0xf7   :  { %v198_v20 = vld [vmem:[#allocation3 + $0x2f0] sm:$0xff]  ;;  %v277_v28 = vpack.c.bf16 %v197_v18, %v189_v16  ;;  %v205_v47 = vld [vmem:[#allocation3 + $0x328] sm:$0xff]  ;;  %v223_v18 = vld [vmem:[#allocation3 + $0x3b8] sm:$0xff] }
  0xf8   :  { %1301 = vmatpush.msra.mxu0 %v1276_v51  ;;  %v278_v40 = vpack.c.bf16 %v198_v20, %v190_v19  ;;  %v215_v51 = vld [vmem:[#allocation3 + $0x378] sm:$0xff]  ;;  %v230_v16 = vld [vmem:[#allocation3 + $0x3f0] sm:$0xff] }
  0xf9   :  { %v231_v19 = vld [vmem:[#allocation3 + $0x3f8] sm:$0xff] }
  0xfa   :  { %v927_v30 = vpop.f32.mrf.mxu2 }
  0xfb   :  { %v928_v31 = vadd.f32 %v927_v30, %v879_v22  ;;  %v279_v30 = vpack.c.bf16 %v199_v24, %v191_v23 }
  0xfc   :  { %v881_v35 = vpop.f32.mrf.mxu1 }
  0xfd   :  { %v976_v32 = vpop.f32.mrf.mxu3  ;;  %v882_v38 = vadd.f32 %v881_v35, %v1912_v59  ;;  %v175_v59 = vld [vmem:[#allocation3 + $0x238] sm:$0xff] }
  0xfe   :  { %v1936_v37 = vadd.f32 %v976_v32, %v928_v31  ;;  %v271_v5 = vpack.c.bf16 %v183_v58, %v175_v59  ;;  %v1273_v32 = vld [vmem:[#allocation8 + $0x10] sm:$0xff] }
  0xff   :  { %1076 = vmatmul.bf16.gmra.mxu1 %v261_v33  ;;  %1125 = vmatmul.bf16.gmra.mxu2 %v262_v34 }
 0x102   :  { %1174 = vmatmul.bf16.gmra.mxu3 %v263_v36  ;;  %v930_v39 = vpop.f32.mrf.mxu2 }
 0x103   :  { %v931_v41 = vadd.f32 %v930_v39, %v882_v38  ;;  %v1272_v39 = vld [vmem:[#allocation8 + $0x8] sm:$0xff] }
 0x104   :  { %v883_v44 = vpop.f32.mrf.mxu1 }
 0x105   :  { %v979_v43 = vpop.f32.mrf.mxu3  ;;  %v884_v49 = vadd.f32 %v883_v44, %v1918_v3  ;;  %v1275_v3 = vld [vmem:[#allocation8 + $0x20] sm:$0xff]  ;;  %v214_v44 = vld [vmem:[#allocation3 + $0x370] sm:$0xff] }
 0x106   :  { %v1939_v48 = vadd.f32 %v979_v43, %v931_v41  ;;  %1302 = vmatpush.msra.mxu0 %v1275_v3  ;;  %v213_v41 = vld [vmem:[#allocation3 + $0x368] sm:$0xff]  ;;  %v206_v43 = vld [vmem:[#allocation3 + $0x330] sm:$0xff] }
 0x107   :  { %v285_v57 = vpack.c.bf16 %v213_v41, %v205_v47  ;;  %v286_v59 = vpack.c.bf16 %v214_v44, %v206_v43 }
 0x108   :  { %1303 = vmatpush.msra.mxu0 %v1274_v17 }
 0x10a   :  { %v932_v60 = vpop.f32.mrf.mxu2  ;;  %1304 = vmatpush.msra.mxu0 %v1273_v32 }
 0x10b   :  { %v933_v61 = vadd.f32 %v932_v60, %v884_v49  ;;  %v287_v60 = vpack.c.bf16 %v215_v51, %v207_v50  ;;  %v1972_v51 = vld [vmem:[%s2016_s2] ss:$0 sm:$0xff] }
 0x10c   :  { %v886_v4 = vpop.f32.mrf.mxu1  ;;  %1305 = vmatpush.msra.mxu0 %v1272_v39 }
 0x10d   :  { %v981_v62 = vpop.f32.mrf.mxu3  ;;  %v887_v7 = vadd.f32 %v886_v4, %v1902_v45 }
 0x10e   :  { %v1942_v6 = vadd.f32 %v981_v62, %v933_v61  ;;  %v1013_v62 = vpop.f32.mrf.mxu0 }
 0x10f   :  { %1081 = vmatmul.bf16.gmra.mxu1 %v269_v63  ;;  %1130 = vmatmul.bf16.gmra.mxu2 %v270_v0  ;;  %v1271_v63 = vld [vmem:[#allocation8] sm:$0xff]  ;;  %v1014_v43 = vadd.f32 %v1013_v62, %v1924_v25 }
 0x110   :  { %1306 = vmatpush.msra.mxu0 %v1271_v63 }
 0x112   :  { %1179 = vmatmul.bf16.gmra.mxu3 %v271_v5  ;;  %v935_v8 = vpop.f32.mrf.mxu2 }
 0x113   :  { %v936_v9 = vadd.f32 %v935_v8, %v887_v7  ;;  %v221_v8 = vld [vmem:[#allocation3 + $0x3a8] sm:$0xff] }
 0x114   :  { %v888_v11 = vpop.f32.mrf.mxu1 }
 0x115   :  { %v984_v10 = vpop.f32.mrf.mxu3  ;;  %v889_v22 = vadd.f32 %v888_v11, %v1908_v55  ;;  %v222_v11 = vld [vmem:[#allocation3 + $0x3b0] sm:$0xff] }
 0x116   :  { %v1945_v15 = vadd.f32 %v984_v10, %v936_v9  ;;  %v1015_v9 = vpop.f32.mrf.mxu0  ;;  %v229_v10 = vld [vmem:[#allocation3 + $0x3e8] sm:$0xff] }
 0x117   :  { %v293_v24 = vpack.c.bf16 %v229_v10, %v221_v8 }
 0x11a   :  { %v937_v26 = vpop.f32.mrf.mxu2 }
 0x11b   :  { %v938_v27 = vadd.f32 %v937_v26, %v889_v22 }
 0x11c   :  { %v891_v29 = vpop.f32.mrf.mxu1 }
 0x11d   :  { %v986_v45 = vpop.f32.mrf.mxu3  ;;  %v892_v33 = vadd.f32 %v891_v29, %v1914_v1 }
 0x11e   :  { %v1948_v31 = vadd.f32 %v986_v45, %v938_v27  ;;  %v295_v27 = vpack.c.bf16 %v231_v19, %v223_v18 }
 0x11f   :  { %1086 = vmatmul.bf16.gmra.mxu1 %v277_v28  ;;  %1135 = vmatmul.bf16.gmra.mxu2 %v278_v40  ;;  %v1018_v40 = vpop.f32.mrf.mxu0 }
 0x122   :  { %1184 = vmatmul.bf16.gmra.mxu3 %v279_v30  ;;  %v940_v34 = vpop.f32.mrf.mxu2 }
 0x123   :  { %v941_v55 = vadd.f32 %v940_v34, %v892_v33 }
 0x124   :  { %v893_v36 = vpop.f32.mrf.mxu1 }
 0x125   :  { %v989_v35 = vpop.f32.mrf.mxu3  ;;  %v894_v49 = vadd.f32 %v893_v36, %v1920_v12 }
 0x126   :  { %v1951_v38 = vadd.f32 %v989_v35, %v941_v55 }
 0x127   :  { %v1020_v47 = vpop.f32.mrf.mxu0 }
 0x12a   :  { %v942_v52 = vpop.f32.mrf.mxu2 }
 0x12b   :  { %v943_v54 = vadd.f32 %v942_v52, %v894_v49 }
 0x12c   :  { %v896_v58 = vpop.f32.mrf.mxu1 }
 0x12d   :  { %v991_v1 = vpop.f32.mrf.mxu3  ;;  %v897_v0 = vadd.f32 %v896_v58, %v1904_v46  ;;  %v294_v46 = vpack.c.bf16 %v230_v16, %v222_v11  ;;  %v1021_v11 = vadd.f32 %v1020_v47, %v1930_v14 }
 0x12e   :  { %v1954_v61 = vadd.f32 %v991_v1, %v943_v54  ;;  %v1016_v1 = vadd.f32 %v1015_v9, %v1926_v42 }
 0x12f   :  { %1091 = vmatmul.bf16.gmra.mxu1 %v285_v57  ;;  %1140 = vmatmul.bf16.gmra.mxu2 %v286_v59  ;;  %v1023_v54 = vpop.f32.mrf.mxu0 }
 0x132   :  { %1189 = vmatmul.bf16.gmra.mxu3 %v287_v60  ;;  %v945_v12 = vpop.f32.mrf.mxu2 }
 0x133   :  { %v946_v4 = vadd.f32 %v945_v12, %v897_v0  ;;  %v1019_v0 = vadd.f32 %v1018_v40, %v1928_v53 }
 0x134   :  { %v898_v3 = vpop.f32.mrf.mxu1 }
 0x135   :  { %v994_v5 = vpop.f32.mrf.mxu3  ;;  %v899_v17 = vadd.f32 %v898_v3, %v1910_v56 }
 0x136   :  { %v1957_v7 = vadd.f32 %v994_v5, %v946_v4 }
 0x137   :  { %v1025_v4 = vpop.f32.mrf.mxu0 }
 0x13a   :  { %v947_v20 = vpop.f32.mrf.mxu2 }
 0x13b   :  { %v948_v22 = vadd.f32 %v947_v20, %v899_v17 }
 0x13c   :  { %v901_v26 = vpop.f32.mrf.mxu1 }
 0x13d   :  { %v996_v23 = vpop.f32.mrf.mxu3  ;;  %v902_v28 = vadd.f32 %v901_v26, %v1916_v2 }
 0x13e   :  { %v1960_v45 = vadd.f32 %v996_v23, %v948_v22 }
 0x13f   :  { %1096 = vmatmul.bf16.gmra.mxu1 %v293_v24  ;;  %1145 = vmatmul.bf16.gmra.mxu2 %v294_v46  ;;  %v1028_v18 = vpop.f32.mrf.mxu0  ;;  %v1024_v24 = vadd.f32 %v1023_v54, %v1933_v21 }
 0x142   :  { %1194 = vmatmul.bf16.gmra.mxu3 %v295_v27  ;;  %v950_v29 = vpop.f32.mrf.mxu2 }
 0x143   :  { %v951_v30 = vadd.f32 %v950_v29, %v902_v28 }
 0x144   :  { %v903_v32 = vpop.f32.mrf.mxu1 }
 0x145   :  { %v999_v56 = vpop.f32.mrf.mxu3  ;;  %v904_v34 = vadd.f32 %v903_v32, %v1922_v13 }
 0x146   :  { %v1963_v33 = vadd.f32 %v999_v56, %v951_v30  ;;  %v1026_v56 = vadd.f32 %v1025_v4, %v1936_v37 }
 0x147   :  { %v1030_v14 = vpop.f32.mrf.mxu0 }
 0x148   :  { %v1031_v54 = vadd.f32 %v1030_v14, %v1942_v6 }
 0x14a   :  { %v952_v55 = vpop.f32.mrf.mxu2 }
 0x14b   :  { %v953_v35 = vadd.f32 %v952_v55, %v904_v34 }
 0x14c   :  { %v1062_v39 = vpop.f32.mrf.mxu1 }
 0x14d   :  { %v1001_v36 = vpop.f32.mrf.mxu3  ;;  %v1063_v44 = vadd.f32 %v1062_v39, %v1014_v43  ;;  %v1029_v43 = vadd.f32 %v1028_v18, %v1939_v48 }
 0x14e   :  { %v1966_v41 = vadd.f32 %v1001_v36, %v953_v35 }
 0x14f   :  { %v1033_v39 = vpop.f32.mrf.mxu0 }
 0x152   :  { %v1111_v2 = vpop.f32.mrf.mxu2 }
 0x153   :  { %v1112_v49 = vadd.f32 %v1111_v2, %v1063_v44 }
 0x154   :  { %v1064_v52 = vpop.f32.mrf.mxu1 }
 0x155   :  { %v1160_v50 = vpop.f32.mrf.mxu3  ;;  %v1065_v59 = vadd.f32 %v1064_v52, %v1016_v1 }
 0x156   :  { %v1161_v13 = vadd.f32 %v1160_v50, %v1112_v49 }
 0x158   :  { %v1255_v57 = vadd.f32 %v1972_v51, %v1161_v13 }
 0x15a   :  { %1307 = vmatmul.f32.vlgmr.msra.gmra.mxu0 %v1255_v57  ;;  %v1113_v58 = vpop.f32.mrf.mxu2  ;;  %v1035_v57 = vpop.f32.mrf.mxu0 }
 0x15b   :  { %v1114_v25 = vadd.f32 %v1113_v58, %v1065_v59 }
 0x15c   :  { %v1067_v62 = vpop.f32.mrf.mxu1 }
 0x15d   :  { %v1162_v60 = vpop.f32.mrf.mxu3  ;;  %v1068_v5 = vadd.f32 %v1067_v62, %v1019_v0 }
 0x15e   :  { %v1163_v63 = vadd.f32 %v1162_v60, %v1114_v25 }
 0x160   :  { %v1256_v12 = vadd.f32 %v1972_v51, %v1163_v63  ;;  %v1034_v63 = vadd.f32 %v1033_v39, %v1945_v15 }
 0x162   :  { %1310 = vmatmul.f32.gmra.mxu0 %v1256_v12  ;;  %v1116_v3 = vpop.f32.mrf.mxu2  ;;  %v1038_v4 = vpop.f32.mrf.mxu0 }
 0x163   :  { %v1117_v8 = vadd.f32 %v1116_v3, %v1068_v5 }
 0x164   :  { %v1069_v42 = vpop.f32.mrf.mxu1 }
 0x165   :  { %v1165_v10 = vpop.f32.mrf.mxu3  ;;  %v1070_v17 = vadd.f32 %v1069_v42, %v1021_v11  ;;  %v1036_v42 = vadd.f32 %v1035_v57, %v1948_v31 }
 0x166   :  { %v1166_v9 = vadd.f32 %v1165_v10, %v1117_v8 }
 0x168   :  { %v1257_v16 = vadd.f32 %v1972_v51, %v1166_v9 }
 0x16a   :  { %1313 = vmatmul.f32.gmra.mxu0 %v1257_v16  ;;  %v1118_v19 = vpop.f32.mrf.mxu2  ;;  %v1040_v15 = vpop.f32.mrf.mxu0 }
 0x16b   :  { %v1119_v20 = vadd.f32 %v1118_v19, %v1070_v17 }
 0x16c   :  { %v1072_v22 = vpop.f32.mrf.mxu1 }
 0x16d   :  { %v1167_v53 = vpop.f32.mrf.mxu3  ;;  %v1073_v26 = vadd.f32 %v1072_v22, %v1024_v24 }
 0x16e   :  { %v1168_v23 = vadd.f32 %v1167_v53, %v1119_v20  ;;  %v1039_v53 = vadd.f32 %v1038_v4, %v1951_v38 }
 0x170   :  { %v1258_v46 = vadd.f32 %v1972_v51, %v1168_v23 }
 0x172   :  { %1316 = vmatmul.f32.gmra.mxu0 %v1258_v46  ;;  %v1121_v27 = vpop.f32.mrf.mxu2 }
 0x173   :  { %v1122_v28 = vadd.f32 %v1121_v27, %v1073_v26 }
 0x174   :  { %v1074_v29 = vpop.f32.mrf.mxu1 }
 0x175   :  { %v1170_v40 = vpop.f32.mrf.mxu3  ;;  %v1075_v34 = vadd.f32 %v1074_v29, %v1026_v56 }
 0x176   :  { %v1171_v30 = vadd.f32 %v1170_v40, %v1122_v28  ;;  %v1043_v28 = vpop.f32.mrf.mxu0  ;;  %v1041_v40 = vadd.f32 %v1040_v15, %v1954_v61 }
 0x178   :  { %v1259_v32 = vadd.f32 %v1972_v51, %v1171_v30 }
 0x17a   :  { %1319 = vmatmul.f32.gmra.mxu0 %v1259_v32  ;;  %v1123_v55 = vpop.f32.mrf.mxu2 }
 0x17b   :  { %v1124_v35 = vadd.f32 %v1123_v55, %v1075_v34  ;;  %v1044_v55 = vadd.f32 %v1043_v28, %v1957_v7 }
 0x17c   :  { %v1077_v21 = vpop.f32.mrf.mxu1 }
 0x17d   :  { %v1172_v36 = vpop.f32.mrf.mxu3  ;;  %v1078_v2 = vadd.f32 %v1077_v21, %v1029_v43 }
 0x17e   :  { %v1173_v47 = vadd.f32 %v1172_v36, %v1124_v35  ;;  %v1045_v36 = vpop.f32.mrf.mxu0 }
 0x180   :  { %v1260_v44 = vadd.f32 %v1972_v51, %v1173_v47 }
 0x182   :  { %1322 = vmatmul.f32.gmra.mxu0 %v1260_v44  ;;  %v1126_v49 = vpop.f32.mrf.mxu2 }
 0x183   :  { %v1127_v50 = vadd.f32 %v1126_v49, %v1078_v2  ;;  %v1046_v2 = vadd.f32 %v1045_v36, %v1960_v45 }
 0x184   :  { %v1079_v37 = vpop.f32.mrf.mxu1 }
 0x185   :  { %v1175_v52 = vpop.f32.mrf.mxu3  ;;  %v1080_v59 = vadd.f32 %v1079_v37, %v1031_v54 }
 0x186   :  { %v1176_v13 = vadd.f32 %v1175_v52, %v1127_v50  ;;  %v1048_v52 = vpop.f32.mrf.mxu0 }
 0x187   :  { %v1049_v57 = vadd.f32 %v1048_v52, %v1963_v33 }
 0x188   :  { %v1261_v1 = vadd.f32 %v1972_v51, %v1176_v13 }
 0x18a   :  { %1325 = vmatmul.f32.gmra.mxu0 %v1261_v1  ;;  %v1128_v58 = vpop.f32.mrf.mxu2 }
 0x18b   :  { %v1129_v25 = vadd.f32 %v1128_v58, %v1080_v59 }
 0x18c   :  { %v1082_v48 = vpop.f32.mrf.mxu1 }
 0x18d   :  { %v1177_v60 = vpop.f32.mrf.mxu3  ;;  %v1083_v12 = vadd.f32 %v1082_v48, %v1034_v63 }
 0x18e   :  { %v1178_v62 = vadd.f32 %v1177_v60, %v1129_v25  ;;  %v1050_v45 = vpop.f32.mrf.mxu0 }
 0x190   :  { %v1262_v0 = vadd.f32 %v1972_v51, %v1178_v62 }
 0x192   :  { %1328 = vmatmul.f32.gmra.mxu0 %v1262_v0  ;;  %v1131_v5 = vpop.f32.mrf.mxu2  ;;  %v1051_v0 = vadd.f32 %v1050_v45, %v1966_v41 }
 0x193   :  { %v1132_v3 = vadd.f32 %v1131_v5, %v1083_v12 }
 0x194   :  { %v1084_v8 = vpop.f32.mrf.mxu1 }
 0x195   :  { %v1180_v6 = vpop.f32.mrf.mxu3  ;;  %v1085_v11 = vadd.f32 %v1084_v8, %v1036_v42 }
 0x196   :  { %v1181_v10 = vadd.f32 %v1180_v6, %v1132_v3 }
 0x198   :  { %v1263_v9 = vadd.f32 %v1972_v51, %v1181_v10  ;;  %v1746_v10 = vld [vmem:[%s2018_s4] ss:$0 sm:$0xff]  ;;  %s1857_s4 = smov [#allocation9]  }
 0x199   :  { %s1376_s13 = sshll.u32 %s1857_s4, 4  ;;  %s1377_s13 = int_to_ptr.vmem [resolvable:$true] %s1376_s13 }
 0x19a   :  { %1331 = vmatmul.f32.gmra.mxu0 %v1263_v9  ;;  %v1133_v16 = vpop.f32.mrf.mxu2 }
 0x19b   :  { %v1134_v17 = vadd.f32 %v1133_v16, %v1085_v11 }
 0x19c   :  { %v1087_v19 = vpop.f32.mrf.mxu1 }
 0x19d   :  { %v1182_v18 = vpop.f32.mrf.mxu3  ;;  %v1088_v23 = vadd.f32 %v1087_v19, %v1039_v53 }
 0x19e   :  { %v1183_v20 = vadd.f32 %v1182_v18, %v1134_v17 }
 0x1a0   :  { %v1264_v22 = vadd.f32 %v1972_v51, %v1183_v20 }
 0x1a2   :  { %1334 = vmatmul.f32.gmra.mxu0 %v1264_v22  ;;  %v1136_v24 = vpop.f32.mrf.mxu2 }
 0x1a3   :  { %v1137_v46 = vadd.f32 %v1136_v24, %v1088_v23 }
 0x1a4   :  { %v1089_v31 = vpop.f32.mrf.mxu1 }
 0x1a5   :  { %v1185_v26 = vpop.f32.mrf.mxu3  ;;  %v1090_v29 = vadd.f32 %v1089_v31, %v1041_v40 }
 0x1a6   :  { %v1186_v27 = vadd.f32 %v1185_v26, %v1137_v46 }
 0x1a8   :  { %v1265_v14 = vadd.f32 %v1972_v51, %v1186_v27 }
 0x1aa   :  { %1337 = vmatmul.f32.gmra.mxu0 %v1265_v14  ;;  %v1138_v30 = vpop.f32.mrf.mxu2 }
 0x1ab   :  { %v1139_v56 = vadd.f32 %v1138_v30, %v1090_v29 }
 0x1ac   :  { %v1092_v38 = vpop.f32.mrf.mxu1 }
 0x1ad   :  { %v1187_v32 = vpop.f32.mrf.mxu3  ;;  %v1093_v21 = vadd.f32 %v1092_v38, %v1044_v55 }
 0x1ae   :  { %v1188_v34 = vadd.f32 %v1187_v32, %v1139_v56 }
 0x1b0   :  { %v1266_v35 = vadd.f32 %v1972_v51, %v1188_v34 }
 0x1b2   :  { %1340 = vmatmul.f32.gmra.mxu0 %v1266_v35  ;;  %v1141_v47 = vpop.f32.mrf.mxu2 }
 0x1b3   :  { %v1142_v39 = vadd.f32 %v1141_v47, %v1093_v21 }
 0x1b4   :  { %v1094_v61 = vpop.f32.mrf.mxu1 }
 0x1b5   :  { %v1190_v43 = vpop.f32.mrf.mxu3  ;;  %v1095_v50 = vadd.f32 %v1094_v61, %v1046_v2 }
 0x1b6   :  { %v1191_v44 = vadd.f32 %v1190_v43, %v1142_v39 }
 0x1b8   :  { %v1267_v49 = vadd.f32 %v1972_v51, %v1191_v44 }
 0x1ba   :  { %1343 = vmatmul.f32.gmra.mxu0 %v1267_v49  ;;  %v1143_v37 = vpop.f32.mrf.mxu2 }
 0x1bb   :  { %v1144_v13 = vadd.f32 %v1143_v37, %v1095_v50 }
 0x1bc   :  { %v1097_v54 = vpop.f32.mrf.mxu1 }
 0x1bd   :  { %v1192_v7 = vpop.f32.mrf.mxu3  ;;  %v1098_v58 = vadd.f32 %v1097_v54, %v1049_v57 }
 0x1be   :  { %v1193_v1 = vadd.f32 %v1192_v7, %v1144_v13 }
 0x1c0   :  { %v1268_v59 = vadd.f32 %v1972_v51, %v1193_v1 }
 0x1c2   :  { %1346 = vmatmul.f32.gmra.mxu0 %v1268_v59  ;;  %v1146_v25 = vpop.f32.mrf.mxu2 }
 0x1c3   :  { %v1147_v60 = vadd.f32 %v1146_v25, %v1098_v58 }
 0x1c4   :  { %v1099_v63 = vpop.f32.mrf.mxu1 }
 0x1c5   :  { %v1195_v48 = vpop.f32.mrf.mxu3  ;;  %v1100_v4 = vadd.f32 %v1099_v63, %v1051_v0 }
 0x1c6   :  { %v1196_v62 = vadd.f32 %v1195_v48, %v1147_v60 }
 0x1c8   :  { %v1269_v12 = vadd.f32 %v1972_v51, %v1196_v62 }
 0x1ca   :  { %1349 = vmatmul.f32.gmra.mxu0 %v1269_v12  ;;  %v1148_v5 = vpop.f32.mrf.mxu2 }
 0x1cb   :  { %v1149_v3 = vadd.f32 %v1148_v5, %v1100_v4 }
 0x1cd   :  { %v1197_v6 = vpop.f32.mrf.mxu3 }
 0x1ce   :  { %v1198_v33 = vadd.f32 %v1197_v6, %v1149_v3 }
 0x1d0   :  { %v1270_v8 = vadd.f32 %v1972_v51, %v1198_v33 }
 0x1d2   :  { %1352 = vmatmul.f32.gmra.mxu0 %v1270_v8 }
 0x1d7   :  { %v1308_v42 = vpop.f32.mrf.mxu0 }
 0x1d8   :  { %v1309_v9 = vadd.f32 %v1746_v10, %v1308_v42 }
 0x1da   :  { %1356 = vst [vmem:[#allocation9] sm:$0xff] %v1309_v9 }
 0x1df   :  { %v1311_v11 = vpop.f32.mrf.mxu0 }
 0x1e0   :  { %v1312_v41 = vadd.f32 %v1746_v10, %v1311_v11 }
 0x1e2   :  { %1357 = vst [vmem:[#allocation9 + $0x8] sm:$0xff] %v1312_v41 }
 0x1e7   :  { %v1314_v16 = vpop.f32.mrf.mxu0 }
 0x1e8   :  { %v1315_v17 = vadd.f32 %v1746_v10, %v1314_v16 }
 0x1ea   :  { %1358 = vst [vmem:[#allocation9 + $0x10] sm:$0xff] %v1315_v17 }
 0x1ef   :  { %v1317_v18 = vpop.f32.mrf.mxu0 }
 0x1f0   :  { %v1318_v15 = vadd.f32 %v1746_v10, %v1317_v18 }
 0x1f2   :  { %1359 = vst [vmem:[#allocation9 + $0x18] sm:$0xff] %v1318_v15 }
 0x1f7   :  { %v1320_v19 = vpop.f32.mrf.mxu0 }
 0x1f8   :  { %v1321_v20 = vadd.f32 %v1746_v10, %v1320_v19 }
 0x1fa   :  { %1360 = vst [vmem:[#allocation9 + $0x20] sm:$0xff] %v1321_v20 }
 0x1ff   :  { %v1323_v51 = vpop.f32.mrf.mxu0 }
 0x200   :  { %v1324_v53 = vadd.f32 %v1746_v10, %v1323_v51 }
 0x202   :  { %1361 = vst [vmem:[#allocation9 + $0x28] sm:$0xff] %v1324_v53 }
 0x207   :  { %v1326_v22 = vpop.f32.mrf.mxu0 }
 0x208   :  { %v1327_v23 = vadd.f32 %v1746_v10, %v1326_v22 }
 0x20a   :  { %1362 = vst [vmem:[#allocation9 + $0x30] sm:$0xff] %v1327_v23 }
 0x20f   :  { %v1329_v24 = vpop.f32.mrf.mxu0 }
 0x210   :  { %v1330_v46 = vadd.f32 %v1746_v10, %v1329_v24 }
 0x212   :  { %1363 = vst [vmem:[#allocation9 + $0x38] sm:$0xff] %v1330_v46 }
 0x217   :  { %v1332_v26 = vpop.f32.mrf.mxu0 }
 0x218   :  { %v1333_v31 = vadd.f32 %v1746_v10, %v1332_v26 }
 0x21a   :  { %1364 = vst [vmem:[#allocation9 + $0x40] sm:$0xff] %v1333_v31 }
 0x21f   :  { %v1335_v27 = vpop.f32.mrf.mxu0 }
 0x220   :  { %v1336_v28 = vadd.f32 %v1746_v10, %v1335_v27 }
 0x222   :  { %1365 = vst [vmem:[#allocation9 + $0x48] sm:$0xff] %v1336_v28 }
 0x227   :  { %v1338_v40 = vpop.f32.mrf.mxu0 }
 0x228   :  { %v1339_v14 = vadd.f32 %v1746_v10, %v1338_v40 }
 0x22a   :  { %1366 = vst [vmem:[#allocation9 + $0x50] sm:$0xff] %v1339_v14 }
 0x22f   :  { %v1341_v29 = vpop.f32.mrf.mxu0 }
 0x230   :  { %v1342_v30 = vadd.f32 %v1746_v10, %v1341_v29 }
 0x232   :  { %1367 = vst [vmem:[#allocation9 + $0x58] sm:$0xff] %v1342_v30 }
 0x237   :  { %v1344_v56 = vpop.f32.mrf.mxu0 }
 0x238   :  { %v1345_v32 = vadd.f32 %v1746_v10, %v1344_v56 }
 0x23a   :  { %1368 = vst [vmem:[#allocation9 + $0x60] sm:$0xff] %v1345_v32 }
 0x23f   :  { %v1347_v38 = vpop.f32.mrf.mxu0 }
 0x240   :  { %v1348_v34 = vadd.f32 %v1746_v10, %v1347_v38 }
 0x242   :  { %1369 = vst [vmem:[#allocation9 + $0x68] sm:$0xff] %v1348_v34 }
 0x247   :  { %v1350_v55 = vpop.f32.mrf.mxu0 }
 0x248   :  { %v1351_v35 = vadd.f32 %v1746_v10, %v1350_v55 }
 0x24a   :  { %1370 = vst [vmem:[#allocation9 + $0x70] sm:$0xff] %v1351_v35 }
 0x24f   :  { %v1353_v36 = vpop.f32.mrf.mxu0 }
 0x250   :  { %v1354_v21 = vadd.f32 %v1746_v10, %v1353_v36 }
 0x252   :  { %1371 = vst [vmem:[#allocation9 + $0x78] sm:$0xff] %v1354_v21 }
 0x253   :  { %1384 = dma.vmem_to_hbm [thread:$0]  %s1377_s13, 2048, %s1379_s16, [#allocation5], %s1855_s10, %s1855_s10, %s1856_s11  }
 0x254   :  { %1847 = dma.done.wait [#allocation5], 2048  }
 0x255   :  { %1848 = vsyncadd [#allocation5], 4294965248 }
 0x256   :  { %1389 = vsyncpa [#allocation4], 1 }
 0x257   :  { %1390 = vsyncpa [#allocation7], 1 }
 0x258   :  { %1391 = vsyncpa [#allocation5], 1 }

</bundles_post_ra>
